<compile_context>
chip_gen: v7x
topology: tpu7x:2x2x1
jax: 0.10.0
libtpu: 0.0.40
codegen_flags: <defaults>
</compile_context>

<pallas_src>
import functools

import jax
import jax.numpy as jnp
from jax import lax
from jax.experimental import pallas as pl
from jax.experimental.pallas import tpu as pltpu


# ---------------------------------------------------------------------------
# Path A: DMA row gather — reads only the kept rows from HBM (exact, any dtype)
# ---------------------------------------------------------------------------
def _dma_gather_kernel(idx_ref, x_hbm, o_ref, sem, *, bblk, batch, remain_t):
    """Gather kept rows with per-row async copies HBM -> output VMEM block.

    idx_ref : SMEM (B * remain_T,) int32   (scalar-prefetched, row-major (b, s))
    x_hbm   : ANY  (T, B, C)               raw HBM ref, no auto-DMA
    o_ref   : VMEM (remain_T, bblk, C)     this grid step's output block
    sem     : DMA semaphores, shape (2,)
    """
    gi = pl.program_id(0)

    def clamped_b(j):
        # Tail blocks (B % bblk != 0): clamp so the HBM read stays in-bounds;
        # the corresponding output columns are dropped on writeback anyway.
        return jnp.minimum(gi * bblk + j, batch - 1)

    def row_copy(j, s, b):
        t = idx_ref[b * remain_t + s]
        return pltpu.make_async_copy(
            x_hbm.at[pl.ds(t, 1), pl.ds(b, 1), :],
            o_ref.at[pl.ds(s, 1), pl.ds(j, 1), :],
            sem.at[j % 2],
        )

    def issue_batch(j):
        b = clamped_b(j)

        def body(s, _):
            row_copy(j, s, b).start()
            return 0

        lax.fori_loop(0, remain_t, body, 0)

    def wait_batch(j):
        b = clamped_b(j)

        def body(s, _):
            row_copy(j, s, b).wait()
            return 0

        lax.fori_loop(0, remain_t, body, 0)

    # Software pipeline over the batch elements of this block: issue copies for
    # element j while waiting on element j-1 (keeps <= 2*remain_T DMAs in flight).
    issue_batch(0)

    def outer(j, _):
        issue_batch(j)
        wait_batch(j - 1)
        return 0

    lax.fori_loop(1, bblk, outer, 0)
    wait_batch(bblk - 1)


# ---------------------------------------------------------------------------
# Path B: one-hot @ x MXU gather — only for tiny float rows
# ---------------------------------------------------------------------------
def _onehot_gather_kernel(idx_ref, x_ref, o_ref, *, bblk):
    """idx_ref: (bblk, remain_T) i32; x_ref: (T, bblk, C); o_ref: (remain_T, bblk, C)."""
    t = x_ref.shape[0]
    remain_t = o_ref.shape[0]
    iota_t = lax.broadcasted_iota(jnp.int32, (t, remain_t), 0)

    for j in range(bblk):  # bblk <= 8: small static unroll, static slices
        idx_row = idx_ref[pl.ds(j, 1), :]                      # (1, remain_T)
        onehot = (iota_t == idx_row).astype(x_ref.dtype)       # (T, remain_T)
        # out[s, c] = sum_t onehot[t, s] * x[t, c] == x[idx[s], c]
        out_b = lax.dot_general(
            onehot, x_ref[:, j, :],
            dimension_numbers=(((0,), (0,)), ((), ())),
            preferred_element_type=o_ref.dtype,
            precision=lax.Precision.HIGHEST,
        )
        o_ref[:, j, :] = out_b


# ---------------------------------------------------------------------------
# Wrapper
# ---------------------------------------------------------------------------
def _batch_block(B):
    # Second-to-last block dim must be a multiple of 8 or equal the full dim.
    return B if B <= 8 else 8


def _use_dma_path(T, B, remain_T, C, dtype, row_bytes_threshold):
    itemsize = jnp.dtype(dtype).itemsize
    if not jnp.issubdtype(jnp.dtype(dtype), jnp.floating):
        return True  # keep integer/bool gathers exact — no MXU on the data path
    if C * itemsize >= row_bytes_threshold:
        return True  # big rows: kept-rows DMA beats the 1/(1-ratio)x read amplification
    bblk = _batch_block(B)
    # Keep the matmul path's double-buffered (in + out) blocks well inside
    # v5e's 16 MiB default scoped-VMEM limit; otherwise use the DMA path,
    # whose VMEM footprint is just the output block.
    block_bytes = 2 * (T + remain_T) * bblk * C * itemsize
    return block_bytes > 12 * 1024 * 1024


def patch_shuffle_gather(patches_tbc: jax.Array, fwd_idx_bt: jax.Array,
                         *, dma_row_bytes_threshold: int = 2048) -> jax.Array:
    """patches_tbc: (T, B, C); fwd_idx_bt: (B, remain_T) int32 -> (remain_T, B, C)."""
    T, B, C = patches_tbc.shape
    remain_T = fwd_idx_bt.shape[1]
    dtype = patches_tbc.dtype
    if remain_T == 0:
        return jnp.zeros((0, B, C), dtype)

    bblk = _batch_block(B)
    grid = (pl.cdiv(B, bblk),)
    out_shape = jax.ShapeDtypeStruct((remain_T, B, C), dtype)
    compiler_params = pltpu.CompilerParams(
        dimension_semantics=("parallel",),   # independent batch blocks (v7x megacore)
        vmem_limit_bytes=48 * 1024 * 1024,   # <= v7x 64 MiB physical; plenty on v5e/v6e
    )

    if _use_dma_path(T, B, remain_T, C, dtype, dma_row_bytes_threshold):
        kernel = functools.partial(
            _dma_gather_kernel, bblk=bblk, batch=B, remain_t=remain_T)
        grid_spec = pltpu.PrefetchScalarGridSpec(
            num_scalar_prefetch=1,                          # fwd_idx -> SMEM
            grid=grid,
            in_specs=[pl.BlockSpec(memory_space=pl.ANY)],   # patches stay in HBM
            out_specs=pl.BlockSpec((remain_T, bblk, C), lambda i, idx: (0, i, 0)),
            scratch_shapes=[pltpu.SemaphoreType.DMA((2,))],
        )
        return pl.pallas_call(
            kernel, out_shape=out_shape, grid_spec=grid_spec,
            compiler_params=compiler_params,
        )(fwd_idx_bt.reshape(-1).astype(jnp.int32), patches_tbc)

    kernel = functools.partial(_onehot_gather_kernel, bblk=bblk)
    return pl.pallas_call(
        kernel,
        out_shape=out_shape,
        grid=grid,
        in_specs=[
            pl.BlockSpec((bblk, remain_T), lambda i: (i, 0)),   # per-step index slab
            pl.BlockSpec((T, bblk, C), lambda i: (0, i, 0)),    # batch block, full C (no pad)
        ],
        out_specs=pl.BlockSpec((remain_T, bblk, C), lambda i: (0, i, 0)),
        compiler_params=compiler_params,
    )(fwd_idx_bt.astype(jnp.int32), patches_tbc)


def patch_shuffle(patches_tbc: jax.Array, ratio: float, key: jax.Array,
                  *, dma_row_bytes_threshold: int = 2048):
    """JAX/Pallas equivalent of PatchShuffle.forward (patches in (T, B, C))."""
    T, B, C = patches_tbc.shape
    remain_T = int(T * (1.0 - ratio))  # matches the module's truncating int()
    if remain_T <= 0:
        empty_idx = jnp.zeros((0, B), jnp.int32)
        return jnp.zeros((0, B, C), patches_tbc.dtype), empty_idx, empty_idx

    # Per-batch random permutations (tiny index bookkeeping, plain JAX).
    # TODO(synk): torch draws the permutations with host-side numpy RNG; here
    # jax.random supplies them, so index *values* differ for a given seed.
    keys = jax.random.split(key, B)
    fwd_bt = jax.vmap(lambda k: jax.random.permutation(k, T))(keys).astype(jnp.int32)
    fwd_bt = fwd_bt[:, :remain_T]                        # (B, remain_T)
    fwd_tb = jnp.transpose(fwd_bt, (1, 0))               # (remain_T, B)
    bwd_tb = jnp.argsort(fwd_tb, axis=0).astype(jnp.int32)

    out_tbc = patch_shuffle_gather(
        patches_tbc, fwd_bt, dma_row_bytes_threshold=dma_row_bytes_threshold)
    return out_tbc, fwd_tb, bwd_tb


if __name__ == "__main__":
    root = jax.random.PRNGKey(0)

    def check(T, B, C, ratio, threshold):
        k_data, k_perm = jax.random.split(
            jax.random.fold_in(root, T * 100000 + B * 1000 + C))
        patches = jax.random.normal(k_data, (T, B, C), dtype=jnp.float32)
        out, fwd_idx, bwd_idx = patch_shuffle(
            patches, ratio, k_perm, dma_row_bytes_threshold=threshold)
        out = jax.block_until_ready(out)

        remain_T = int(T * (1 - ratio))
        assert out.shape == (remain_T, B, C)
        assert fwd_idx.shape == bwd_idx.shape == (remain_T, B)
        gather_idx = jnp.broadcast_to(fwd_idx[:, :, None], (remain_T, B, C))
        ref = jnp.take_along_axis(patches, gather_idx, axis=0)
        assert jnp.allclose(out, ref, rtol=1e-6, atol=1e-6), "Pallas gather mismatch"
        ref_bwd = jnp.argsort(fwd_idx, axis=0).astype(jnp.int32)
        assert jnp.array_equal(bwd_idx, ref_bwd), "backward index mismatch"

    # Path B: one-hot MXU gather (tiny 512 B rows), single grid step.
    check(T=16, B=4, C=128, ratio=0.75, threshold=2048)
    # Path A: DMA row gather (forced), non-128-aligned C, B > bblk (tail block).
    check(T=16, B=10, C=96, ratio=0.5, threshold=1)
    # Path B with a tail block (B=10 -> bblk=8, grid=2).
    check(T=16, B=10, C=128, ratio=0.75, threshold=2048)

    print("KERNEL_OK")
</pallas_src>

<mosaic_0001>
module attributes {stable_mosaic.version = 11 : i64} {
  func.func @_onehot_gather_kernel(%arg0: i32, %arg1: memref<4x4xi32, #tpu.memory_space<vmem>>, %arg2: memref<16x4x128xf32, #tpu.memory_space<vmem>>, %arg3: memref<4x4x128xf32, #tpu.memory_space<vmem>>) attributes {dimension_semantics = [#tpu.dimension_semantics<parallel>], iteration_bounds = array<i64: 1>, scalar_prefetch = 0 : i64, scratch_operands = 0 : i64, tpu.core_type = #tpu.core_type<tc>, window_params = [{transform_indices = @transform_0, window_bounds = array<i64: 4, 4>}, {transform_indices = @transform_1, window_bounds = array<i64: 16, 4, 128>}, {transform_indices = @transform_2, window_bounds = array<i64: 4, 4, 128>}]} {
    %0 = tpu.iota {dimensions = array<i32: 0>} : vector<16x4xi32>
    %c0 = arith.constant 0 : index
    %c0_0 = arith.constant 0 : index
    %1 = vector.load %arg1[%c0, %c0_0] : memref<4x4xi32, #tpu.memory_space<vmem>>, vector<1x4xi32>
    %2 = vector.broadcast %1 : vector<1x4xi32> to vector<16x4xi32>
    %3 = arith.cmpi eq, %0, %2 : vector<16x4xi32>
    %4 = arith.extui %3 : vector<16x4xi1> to vector<16x4xi32>
    %5 = arith.sitofp %4 : vector<16x4xi32> to vector<16x4xf32>
    %c0_1 = arith.constant 0 : index
    %c0_2 = arith.constant 0 : index
    %c0_3 = arith.constant 0 : index
    %6 = vector.load %arg2[%c0_1, %c0_2, %c0_3] : memref<16x4x128xf32, #tpu.memory_space<vmem>>, vector<16x1x128xf32>
    %7 = vector.shape_cast %6 : vector<16x1x128xf32> to vector<16x128xf32>
    %cst = arith.constant dense<0.000000e+00> : vector<4x128xf32>
    %8 = tpu.matmul %5, %7, %cst {dimension_numbers = #tpu.dot_dimension_numbers<[0], [0], [1], [1], [0, 1, 1, 1], [], []>, precision = #tpu.contract_precision<fp32>} : vector<16x4xf32>, vector<16x128xf32>, vector<4x128xf32> -> vector<4x128xf32>
    %c0_4 = arith.constant 0 : index
    %c0_5 = arith.constant 0 : index
    %c0_6 = arith.constant 0 : index
    %9 = vector.load %arg3[%c0_4, %c0_5, %c0_6] : memref<4x4x128xf32, #tpu.memory_space<vmem>>, vector<4x1x128xf32>
    %10 = vector.shape_cast %9 : vector<4x1x128xf32> to vector<4x128xf32>
    %11 = vector.shape_cast %8 : vector<4x128xf32> to vector<4x1x128xf32>
    tpu.vector_store %arg3[%c0_4, %c0_5, %c0_6], %11 {strides = array<i32>} : memref<4x4x128xf32, #tpu.memory_space<vmem>>, vector<4x1x128xf32>,
    %c1 = arith.constant 1 : index
    %c0_7 = arith.constant 0 : index
    %12 = vector.load %arg1[%c1, %c0_7] : memref<4x4xi32, #tpu.memory_space<vmem>>, vector<1x4xi32>
    %13 = vector.broadcast %12 : vector<1x4xi32> to vector<16x4xi32>
    %14 = arith.cmpi eq, %0, %13 : vector<16x4xi32>
    %15 = arith.extui %14 : vector<16x4xi1> to vector<16x4xi32>
    %16 = arith.sitofp %15 : vector<16x4xi32> to vector<16x4xf32>
    %c0_8 = arith.constant 0 : index
    %c1_9 = arith.constant 1 : index
    %c0_10 = arith.constant 0 : index
    %17 = vector.load %arg2[%c0_8, %c1_9, %c0_10] : memref<16x4x128xf32, #tpu.memory_space<vmem>>, vector<16x1x128xf32>
    %18 = vector.shape_cast %17 : vector<16x1x128xf32> to vector<16x128xf32>
    %cst_11 = arith.constant dense<0.000000e+00> : vector<4x128xf32>
    %19 = tpu.matmul %16, %18, %cst_11 {dimension_numbers = #tpu.dot_dimension_numbers<[0], [0], [1], [1], [0, 1, 1, 1], [], []>, precision = #tpu.contract_precision<fp32>} : vector<16x4xf32>, vector<16x128xf32>, vector<4x128xf32> -> vector<4x128xf32>
    %c0_12 = arith.constant 0 : index
    %c1_13 = arith.constant 1 : index
    %c0_14 = arith.constant 0 : index
    %20 = vector.load %arg3[%c0_12, %c1_13, %c0_14] : memref<4x4x128xf32, #tpu.memory_space<vmem>>, vector<4x1x128xf32>
    %21 = vector.shape_cast %20 : vector<4x1x128xf32> to vector<4x128xf32>
    %22 = vector.shape_cast %19 : vector<4x128xf32> to vector<4x1x128xf32>
    tpu.vector_store %arg3[%c0_12, %c1_13, %c0_14], %22 {strides = array<i32>} : memref<4x4x128xf32, #tpu.memory_space<vmem>>, vector<4x1x128xf32>,
    %c2 = arith.constant 2 : index
    %c0_15 = arith.constant 0 : index
    %23 = vector.load %arg1[%c2, %c0_15] : memref<4x4xi32, #tpu.memory_space<vmem>>, vector<1x4xi32>
    %24 = vector.broadcast %23 : vector<1x4xi32> to vector<16x4xi32>
    %25 = arith.cmpi eq, %0, %24 : vector<16x4xi32>
    %26 = arith.extui %25 : vector<16x4xi1> to vector<16x4xi32>
    %27 = arith.sitofp %26 : vector<16x4xi32> to vector<16x4xf32>
    %c0_16 = arith.constant 0 : index
    %c2_17 = arith.constant 2 : index
    %c0_18 = arith.constant 0 : index
    %28 = vector.load %arg2[%c0_16, %c2_17, %c0_18] : memref<16x4x128xf32, #tpu.memory_space<vmem>>, vector<16x1x128xf32>
    %29 = vector.shape_cast %28 : vector<16x1x128xf32> to vector<16x128xf32>
    %cst_19 = arith.constant dense<0.000000e+00> : vector<4x128xf32>
    %30 = tpu.matmul %27, %29, %cst_19 {dimension_numbers = #tpu.dot_dimension_numbers<[0], [0], [1], [1], [0, 1, 1, 1], [], []>, precision = #tpu.contract_precision<fp32>} : vector<16x4xf32>, vector<16x128xf32>, vector<4x128xf32> -> vector<4x128xf32>
    %c0_20 = arith.constant 0 : index
    %c2_21 = arith.constant 2 : index
    %c0_22 = arith.constant 0 : index
    %31 = vector.load %arg3[%c0_20, %c2_21, %c0_22] : memref<4x4x128xf32, #tpu.memory_space<vmem>>, vector<4x1x128xf32>
    %32 = vector.shape_cast %31 : vector<4x1x128xf32> to vector<4x128xf32>
    %33 = vector.shape_cast %30 : vector<4x128xf32> to vector<4x1x128xf32>
    tpu.vector_store %arg3[%c0_20, %c2_21, %c0_22], %33 {strides = array<i32>} : memref<4x4x128xf32, #tpu.memory_space<vmem>>, vector<4x1x128xf32>,
    %c3 = arith.constant 3 : index
    %c0_23 = arith.constant 0 : index
    %34 = vector.load %arg1[%c3, %c0_23] : memref<4x4xi32, #tpu.memory_space<vmem>>, vector<1x4xi32>
    %35 = vector.broadcast %34 : vector<1x4xi32> to vector<16x4xi32>
    %36 = arith.cmpi eq, %0, %35 : vector<16x4xi32>
    %37 = arith.extui %36 : vector<16x4xi1> to vector<16x4xi32>
    %38 = arith.sitofp %37 : vector<16x4xi32> to vector<16x4xf32>
    %c0_24 = arith.constant 0 : index
    %c3_25 = arith.constant 3 : index
    %c0_26 = arith.constant 0 : index
    %39 = vector.load %arg2[%c0_24, %c3_25, %c0_26] : memref<16x4x128xf32, #tpu.memory_space<vmem>>, vector<16x1x128xf32>
    %40 = vector.shape_cast %39 : vector<16x1x128xf32> to vector<16x128xf32>
    %cst_27 = arith.constant dense<0.000000e+00> : vector<4x128xf32>
    %41 = tpu.matmul %38, %40, %cst_27 {dimension_numbers = #tpu.dot_dimension_numbers<[0], [0], [1], [1], [0, 1, 1, 1], [], []>, precision = #tpu.contract_precision<fp32>} : vector<16x4xf32>, vector<16x128xf32>, vector<4x128xf32> -> vector<4x128xf32>
    %c0_28 = arith.constant 0 : index
    %c3_29 = arith.constant 3 : index
    %c0_30 = arith.constant 0 : index
    %42 = vector.load %arg3[%c0_28, %c3_29, %c0_30] : memref<4x4x128xf32, #tpu.memory_space<vmem>>, vector<4x1x128xf32>
    %43 = vector.shape_cast %42 : vector<4x1x128xf32> to vector<4x128xf32>
    %44 = vector.shape_cast %41 : vector<4x128xf32> to vector<4x1x128xf32>
    tpu.vector_store %arg3[%c0_28, %c3_29, %c0_30], %44 {strides = array<i32>} : memref<4x4x128xf32, #tpu.memory_space<vmem>>, vector<4x1x128xf32>,
    return
  }
  func.func @transform_0(%arg0: i32) -> (i32, i32) {
    %c0_i32 = arith.constant 0 : i32
    %c0_i32_0 = arith.constant 0 : i32
    return %arg0, %c0_i32 : i32, i32
  }
  func.func @transform_1(%arg0: i32) -> (i32, i32, i32) {
    %c0_i32 = arith.constant 0 : i32
    %c0_i32_0 = arith.constant 0 : i32
    %c0_i32_1 = arith.constant 0 : i32
    return %c0_i32, %arg0, %c0_i32_0 : i32, i32, i32
  }
  func.func @transform_2(%arg0: i32) -> (i32, i32, i32) {
    %c0_i32 = arith.constant 0 : i32
    %c0_i32_0 = arith.constant 0 : i32
    %c0_i32_1 = arith.constant 0 : i32
    return %c0_i32, %arg0, %c0_i32_0 : i32, i32, i32
  }
}

</mosaic_0001>

<bundles_post_ra>
// kernel: tpu_custom_call.1
= control target key start
LH: loop header
LB: loop body
LE: loop exit
PB: predicated region body
PF: predicated region fallthrough
CT: control target
= control target key end

     0   :  { %7 = vsyncpa [#allocation3], 0  ;;  %s3267_s0 = inlined_call_operand.hbm [shape: s32[4,4], index: 0, kind: input, shape index: {}]   ;;  %s3268_s1 = inlined_call_operand.hbm [shape: f32[16,4,128], index: 1, kind: input, shape index: {}]   ;;  %s3269_s2 = inlined_call_operand.hbm [shape: f32[4,4,128], index: 2, kind: output, shape index: {}]  }
   0x1   :  { %8 = vsyncpa [#allocation6], 0 }
   0x2   :  { %9 = vsyncpa [#allocation4], 0  ;;  %s2938_s9 = smov [#allocation2]   ;;  %s2939_s11 = smov [#allocation5]  }
   0x3   :  { %s16_s10 = sshll.u32 %s2938_s9, 4  ;;  %s25_s12 = sshll.u32 %s2939_s11, 4  ;;  %s17_s10 = int_to_ptr.vmem [resolvable:$true] %s16_s10  ;;  %s2962_s12 = int_to_ptr.vmem [resolvable:$true] %s25_s12 }
   0x4   :  { %s2866_s15 = scalar_lea.hbm %s3267_s0, 64 }
   0x5   :  { %p2867_p0 = scmp.ne.s32.totalorder %s3267_s0, %s2866_s15  ;;  %p2870_p1 = scmp.lt.u32.totalorder %s2866_s15, %s3267_s0 }
   0x7   :  { %p2872_p2 = pnand %p2870_p1, %p2867_p0 }
   0x9   :  { %2875 = shalt.err (!%p2872_p2)
}
   0xa   :  { %s2876_s20 = scalar_lea.vmem %s17_s10, 64  ;;  %p2881_p4 = scmp.lt.s32.totalorder %s17_s10, %s17_s10 }
   0xb   :  { %p2877_p3 = scmp.ne.s32.totalorder %s17_s10, %s2876_s20  ;;  %p2882_p5 = scmp.lt.s32.totalorder %s2876_s20, %s2876_s20 }
   0xd   :  { %p2883_p6 = por %p2882_p5, %p2881_p4 }
   0xf   :  { %p2884_p7 = pnand %p2883_p6, %p2877_p3 }
  0x11   :  { %2887 = shalt.err (!%p2884_p7)
}
  0x12   :  { %19 = dma.hbm_to_vmem [thread:$0]  %s3267_s0, 64, %s17_s10, [#allocation3]  }
  0x13   :  { %s2888_s25 = scalar_lea.hbm %s3268_s1, 1024 }
  0x14   :  { %p2889_p8 = scmp.ne.s32.totalorder %s3268_s1, %s2888_s25  ;;  %p2892_p9 = scmp.lt.u32.totalorder %s2888_s25, %s3268_s1 }
  0x16   :  { %p2894_p10 = pnand %p2892_p9, %p2889_p8 }
  0x18   :  { %2897 = shalt.err (!%p2894_p10)
}
  0x19   :  { %s2898_s30 = scalar_lea.vmem %s2962_s12, 1024  ;;  %p2903_p12 = scmp.lt.s32.totalorder %s2962_s12, %s2962_s12 }
  0x1a   :  { %p2899_p11 = scmp.ne.s32.totalorder %s2962_s12, %s2898_s30  ;;  %p2904_p13 = scmp.lt.s32.totalorder %s2898_s30, %s2898_s30 }
  0x1c   :  { %p2905_p0 = por %p2904_p13, %p2903_p12 }
  0x1e   :  { %p2906_p1 = pnand %p2905_p0, %p2899_p11 }
  0x20   :  { %2909 = shalt.err (!%p2906_p1)
}
  0x21   :  { %s2940_s0 = smov 64   ;;  %s2941_s3 = smov 4  }
  0x22   :  { %31 = dma.hbm_to_vmem [thread:$0]  %s3268_s1, 1024, %s2962_s12, [#allocation6], %s2940_s0, %s2940_s0, %s2941_s3  }
  0x23   :  { %2932 = dma.done.wait [#allocation3], 64  }
  0x24   :  { %2933 = vsyncadd [#allocation3], 4294967232 }
  0x25   :  { %2934 = dma.done.wait [#allocation6], 1024  }
  0x26   :  { %2935 = vsyncadd [#allocation6], 4294966272  ;;  %v38_v0 = vlaneseq  ;;  %v2467_v3 = vld [vmem:[#allocation2] ss:$0 sm:$0xff]  ;;  %v2472_v4 = vld [vmem:[#allocation2 + $0x1] ss:$0 sm:$0xff] }
  0x27   :  { %v2477_v5 = vld [vmem:[#allocation2 + $0x2] ss:$0 sm:$0xff]  ;;  %v2482_v6 = vld [vmem:[#allocation2 + $0x3] ss:$0 sm:$0xff]  ;;  %v2942_v7 = vmov 0.0   ;;  %vm117_vm8 = vcmask 1041409  }
  0x28   :  { %v2996_v1 = vshrl.u32 %v38_v0, 7  ;;  %v53_v12 = vld [vmem:[#allocation5 + $0x4] sm:$0x1]  ;;  %v52_v20 = vld [vmem:[#allocation5] sm:$0x1]  ;;  %vm120_vm9 = vcmask 1042434  }
  0x29   :  { %v116_v21 = vrot.slane %v53_v12, 7  ;;  %v54_v22 = vld [vmem:[#allocation5 + $0x8] sm:$0x1]  ;;  %v55_v23 = vld [vmem:[#allocation5 + $0xc] sm:$0x1]  ;;  %vm123_vm10 = vcmask 1043459  }
  0x2a   :  { %v40_v2 = vadd.s32 8, %v2996_v1  ;;  %vm46_vm0 = vcmp.eq.s32.totalorder %v2996_v1, %v2467_v3  ;;  %vm654_vm1 = vcmp.eq.s32.totalorder %v2996_v1, %v2472_v4  ;;  %vm1254_vm4 = vcmp.eq.s32.totalorder %v2996_v1, %v2477_v5  ;;  %v56_v25 = vld [vmem:[#allocation5 + $0x10] sm:$0x1]  ;;  %v57_v26 = vld [vmem:[#allocation5 + $0x14] sm:$0x1]  ;;  %s2946_s1 = smov [#allocation7]  }
  0x2b   :  { %v2468_v8 = vsel %vm46_vm0, 1.0, %v2942_v7  ;;  %v2473_v9 = vsel %vm654_vm1, 1.0, %v2942_v7  ;;  %vm1854_vm5 = vcmp.eq.s32.totalorder %v2996_v1, %v2482_v6  ;;  %v2478_v15 = vsel %vm1254_vm4, 1.0, %v2942_v7  ;;  %v58_v27 = vld [vmem:[#allocation5 + $0x18] sm:$0x1]  ;;  %s2454_s6 = sshll.u32 %s2946_s1, 4  ;;  %s2455_s6 = int_to_ptr.vmem [resolvable:$true] %s2454_s6 }
  0x2c   :  { %vm47_vm2 = vcmp.eq.s32.totalorder %v40_v2, %v2467_v3  ;;  %vm655_vm3 = vcmp.eq.s32.totalorder %v40_v2, %v2472_v4  ;;  %v2848_v13 = vpack.i.bf16 %v2473_v9, %v2468_v8  ;;  %v2483_v16 = vsel %vm1854_vm5, 1.0, %v2942_v7  ;;  %v61_v28 = vld [vmem:[#allocation5 + $0x24] sm:$0x1]  ;;  %v62_v29 = vld [vmem:[#allocation5 + $0x28] sm:$0x1]  ;;  %s2910_s7 = scalar_lea.vmem %s2455_s6, 256  ;;  %p2915_p3 = scmp.lt.s32.totalorder %s2455_s6, %s2455_s6 }
  0x2d   :  { %v2469_v10 = vsel %vm47_vm2, 1.0, %v2942_v7  ;;  %v2474_v11 = vsel %vm655_vm3, 1.0, %v2942_v7  ;;  %vm1255_vm6 = vcmp.eq.s32.totalorder %v40_v2, %v2477_v5  ;;  %vm1855_vm7 = vcmp.eq.s32.totalorder %v40_v2, %v2482_v6  ;;  %v63_v30 = vld [vmem:[#allocation5 + $0x2c] sm:$0x1]  ;;  %v59_v32 = vld [vmem:[#allocation5 + $0x1c] sm:$0x1]  ;;  %p2911_p2 = scmp.ne.s32.totalorder %s2455_s6, %s2910_s7  ;;  %p2916_p4 = scmp.lt.s32.totalorder %s2910_s7, %s2910_s7 }
  0x2e   :  { %v2850_v14 = vpack.i.bf16 %v2474_v11, %v2469_v10  ;;  %2849 = vxpose.xlu0.b32.start [1/2] (short) (narrow) %v2848_v13, 8  ;;  %v2857_v17 = vpack.i.bf16 %v2483_v16, %v2478_v15  ;;  %v2479_v18 = vsel %vm1255_vm6, 1.0, %v2942_v7  ;;  %v2484_v19 = vsel %vm1855_vm7, 1.0, %v2942_v7  ;;  %v64_v33 = vld [vmem:[#allocation5 + $0x30] sm:$0x1] }
  0x2f   :  { %v2859_v24 = vpack.i.bf16 %v2484_v19, %v2479_v18  ;;  %v118_v31 = vsel %vm117_vm8, %v116_v21, %v52_v20  ;;  %v119_v34 = vrot.slane %v54_v22, 6  ;;  %v122_v35 = vrot.slane %v55_v23, 5  ;;  %v60_v36 = vld [vmem:[#allocation5 + $0x20] sm:$0x1]  ;;  %v65_v37 = vld [vmem:[#allocation5 + $0x34] sm:$0x1]  ;;  %p2917_p5 = por %p2916_p4, %p2915_p3 }
  0x30   :  { %2858 = vxpose.xlu1.b32.start [1/2] (short) (narrow) %v2857_v17, 8  ;;  %v125_v38 = vrot.slane %v56_v25, 4  ;;  %vm126_vm11 = vcmask 1044484   ;;  %v128_v39 = vrot.slane %v57_v26, 3  ;;  %v66_v40 = vld [vmem:[#allocation5 + $0x38] sm:$0x1] }
  0x31   :  { %v121_v41 = vsel %vm120_vm9, %v119_v34, %v118_v31  ;;  %vm129_vm12 = vcmask 1045509   ;;  %v131_v42 = vrot.slane %v58_v27, 2  ;;  %v2943_v43 = vmov 0.0|0.0   ;;  %v661_v46 = vld [vmem:[#allocation5 + $0x5] sm:$0x1]  ;;  %p2918_p6 = pnand %p2917_p5, %p2911_p2 }
  0x32   :  { %2851 = vxpose.xlu0.b32.end [2/2] (short) (narrow) %v2850_v14, 8  ;;  %2727 = vmatprep.subr.bf16.mxu0 %v2943_v43  ;;  %v124_v44 = vsel %vm123_vm10, %v122_v35, %v121_v41  ;;  %vm132_vm13 = vcmask 1046534   ;;  %v134_v45 = vrot.slane %v59_v32, 1  ;;  %vm135_vm14 = vcmask 1047559   ;;  %v67_v47 = vld [vmem:[#allocation5 + $0x3c] sm:$0x1] }
  0x33   :  { %2745 = vmatprep.subr.bf16.mxu1 %v2943_v43  ;;  %v127_v48 = vsel %vm126_vm11, %v125_v38, %v124_v44  ;;  %v137_v49 = vrot.slane %v61_v28, 7  ;;  %v139_v50 = vrot.slane %v62_v29, 6  ;;  %v141_v51 = vrot.slane %v63_v30, 5  ;;  %v660_v54 = vld [vmem:[#allocation5 + $0x1] sm:$0x1] }
  0x34   :  { %2860 = vxpose.xlu1.b32.end [2/2] (short) (narrow) %v2859_v24, 8  ;;  %v130_v52 = vsel %vm129_vm12, %v128_v39, %v127_v48  ;;  %v143_v53 = vrot.slane %v64_v33, 4  ;;  %v662_v55 = vld [vmem:[#allocation5 + $0x9] sm:$0x1]  ;;  %v145_v58 = vrot.slane %v65_v37, 3  ;;  %v724_v60 = vrot.slane %v661_v46, 7 }
  0x35   :  { %v133_v56 = vsel %vm132_vm13, %v131_v42, %v130_v52  ;;  %v138_v57 = vsel %vm117_vm8, %v137_v49, %v60_v36  ;;  %v663_v59 = vld [vmem:[#allocation5 + $0xd] sm:$0x1]  ;;  %v147_v63 = vrot.slane %v66_v40, 2  ;;  %v149_v0 = vrot.slane %v67_v47, 1  ;;  %v664_v2 = vld [vmem:[#allocation5 + $0x11] sm:$0x1] }
  0x36   :  { %v136_v61 = vsel %vm135_vm14, %v134_v45, %v133_v56  ;;  %v140_v62 = vsel %vm120_vm9, %v139_v50, %v138_v57  ;;  %v665_v3 = vld [vmem:[#allocation5 + $0x15] sm:$0x1]  ;;  %v666_v6 = vld [vmem:[#allocation5 + $0x19] sm:$0x1]  ;;  %v667_v8 = vld [vmem:[#allocation5 + $0x1d] sm:$0x1]  ;;  %v725_v9 = vsel %vm117_vm8, %v724_v60, %v660_v54 }
  0x37   :  { %v142_v4 = vsel %vm123_vm10, %v141_v51, %v140_v62  ;;  %v158_v5 = vand.u32 4294901760, %v136_v61  ;;  %v726_v10 = vrot.slane %v662_v55, 6  ;;  %v668_v12 = vld [vmem:[#allocation5 + $0x21] sm:$0x1]  ;;  %v669_v13 = vld [vmem:[#allocation5 + $0x25] sm:$0x1] }
  0x38   :  { %v144_v11 = vsel %vm126_vm11, %v143_v53, %v142_v4  ;;  %v670_v14 = vld [vmem:[#allocation5 + $0x29] sm:$0x1]  ;;  %v671_v17 = vld [vmem:[#allocation5 + $0x2d] sm:$0x1]  ;;  %v672_v18 = vld [vmem:[#allocation5 + $0x31] sm:$0x1] }
  0x39   :  { %v146_v15 = vsel %vm129_vm12, %v145_v58, %v144_v11  ;;  %v3026_v16 = vsub.f32 %v136_v61, %v158_v5  ;;  %v727_v19 = vsel %vm120_vm9, %v726_v10, %v725_v9  ;;  %v728_v20 = vrot.slane %v663_v59, 5  ;;  %v673_v22 = vld [vmem:[#allocation5 + $0x35] sm:$0x1]  ;;  %v674_v27 = vld [vmem:[#allocation5 + $0x39] sm:$0x1] }
  0x3a   :  { %v148_v21 = vsel %vm132_vm13, %v147_v63, %v146_v15  ;;  %v730_v23 = vrot.slane %v664_v2, 4  ;;  %v732_v24 = vrot.slane %v665_v3, 3  ;;  %v734_v25 = vrot.slane %v666_v6, 2  ;;  %v675_v32 = vld [vmem:[#allocation5 + $0x3d] sm:$0x1] }
  0x3b   :  { %v150_v26 = vsel %vm135_vm14, %v149_v0, %v148_v21  ;;  %v729_v28 = vsel %vm123_vm10, %v728_v20, %v727_v19  ;;  %v736_v29 = vrot.slane %v667_v8, 1  ;;  %v738_v30 = vrot.slane %v669_v13, 7  ;;  %v1269_v15 = vld [vmem:[#allocation5 + $0x26] sm:$0x1]  ;;  %v1260_v21 = vld [vmem:[#allocation5 + $0x2] sm:$0x1] }
  0x3c   :  { %v161_v31 = vand.u32 4294901760, %v150_v26  ;;  %v731_v33 = vsel %vm126_vm11, %v730_v23, %v729_v28  ;;  %v740_v34 = vrot.slane %v670_v14, 6  ;;  %v742_v35 = vrot.slane %v671_v17, 5  ;;  %v1261_v14 = vld [vmem:[#allocation5 + $0x6] sm:$0x1] }
  0x3d   :  { %v733_v36 = vsel %vm129_vm12, %v732_v24, %v731_v33  ;;  %v739_v37 = vsel %vm117_vm8, %v738_v30, %v668_v12  ;;  %v744_v38 = vrot.slane %v672_v18, 4  ;;  %v746_v39 = vrot.slane %v673_v22, 3  ;;  %v1262_v17 = vld [vmem:[#allocation5 + $0xa] sm:$0x1]  ;;  %v1263_v22 = vld [vmem:[#allocation5 + $0xe] sm:$0x1] }
  0x3e   :  { %v3035_v40 = vpack.c.bf16 %v161_v31, %v158_v5  ;;  %v3037_v41 = vsub.f32 %v150_v26, %v161_v31  ;;  %v735_v42 = vsel %vm132_vm13, %v734_v25, %v733_v36  ;;  %v741_v44 = vsel %vm120_vm9, %v740_v34, %v739_v37  ;;  %v1270_v18 = vld [vmem:[#allocation5 + $0x2a] sm:$0x1]  ;;  %v1268_v23 = vld [vmem:[#allocation5 + $0x22] sm:$0x1]  ;;  %v1264_v24 = vld [vmem:[#allocation5 + $0x12] sm:$0x1] }
  0x3f   :  { %v737_v45 = vsel %vm135_vm14, %v736_v29, %v735_v42  ;;  %v743_v46 = vsel %vm123_vm10, %v742_v35, %v741_v44  ;;  %v748_v47 = vrot.slane %v674_v27, 2  ;;  %v750_v48 = vrot.slane %v675_v32, 1  ;;  %v1271_v25 = vld [vmem:[#allocation5 + $0x2e] sm:$0x1]  ;;  %v1272_v26 = vld [vmem:[#allocation5 + $0x32] sm:$0x1] }
  0x40   :  { %2729 = vmatpush3.bf16.msra.mxu0 %v3035_v40  ;;  %v745_v49 = vsel %vm126_vm11, %v744_v38, %v743_v46  ;;  %v758_v50 = vand.u32 4294901760, %v737_v45  ;;  %v237_v51 = vand.u32 4294901760, %v3026_v16  ;;  %vm2944_vm15 = vmmov 0   ;;  %v1265_v28 = vld [vmem:[#allocation5 + $0x16] sm:$0x1] }
  0x41   :  { %v747_v52 = vsel %vm129_vm12, %v746_v39, %v745_v49  ;;  %2563 = vmatprep.mubr.msk.f32.mxu0 %vm2944_vm15, %v2942_v7  ;;  %2730 = vmatprep.subr.bf16.mxu0 %v2943_v43  ;;  %v244_v53 = vand.u32 4294901760, %v3037_v41  ;;  %v2734_v54 = vpack.c.bf16 %v3037_v41, %v3026_v16  ;;  %v1324_v19 = vrot.slane %v1261_v14, 7  ;;  %v1273_v29 = vld [vmem:[#allocation5 + $0x36] sm:$0x1]  ;;  %v1861_v32 = vld [vmem:[#allocation5 + $0x7] sm:$0x1] }
  0x42   :  { %v749_v55 = vsel %vm132_vm13, %v748_v47, %v747_v52  ;;  %v3054_v56 = vsub.f32 %v737_v45, %v758_v50  ;;  %2605 = vmatprep.mubr.msk.f32.mxu1 %vm2944_vm15, %v2942_v7  ;;  %v238_v57 = vsub.f32 %v3026_v16, %v237_v51  ;;  %v1338_v20 = vrot.slane %v1269_v15, 7  ;;  %v1266_v33 = vld [vmem:[#allocation5 + $0x1a] sm:$0x1]  ;;  %v1267_v38 = vld [vmem:[#allocation5 + $0x1e] sm:$0x1] }
  0x43   :  { %v751_v58 = vsel %vm135_vm14, %v750_v48, %v749_v55  ;;  %v245_v59 = vsub.f32 %v3037_v41, %v244_v53  ;;  %v3077_v12 = vpack.c.bf16 %v244_v53, %v237_v51  ;;  %v1325_v27 = vsel %vm117_vm8, %v1324_v19, %v1260_v21  ;;  %v1274_v34 = vld [vmem:[#allocation5 + $0x3a] sm:$0x1]  ;;  %v1275_v39 = vld [vmem:[#allocation5 + $0x3e] sm:$0x1]  ;;  %v1860_v55 = vld [vmem:[#allocation5 + $0x3] sm:$0x1] }
  0x44   :  { %v761_v60 = vand.u32 4294901760, %v751_v58  ;;  %v239_v61 = vand.u32 4294901760, %v238_v57  ;;  %v837_v62 = vand.u32 4294901760, %v3054_v56  ;;  %v1326_v30 = vrot.slane %v1262_v17, 6  ;;  %v1866_v14 = vld [vmem:[#allocation5 + $0x1b] sm:$0x1] }
  0x45   :  { %v246_v63 = vand.u32 4294901760, %v245_v59  ;;  %v1328_v31 = vrot.slane %v1263_v22, 5  ;;  %v1330_v35 = vrot.slane %v1264_v24, 4  ;;  %v1332_v36 = vrot.slane %v1265_v28, 3  ;;  %v1867_v15 = vld [vmem:[#allocation5 + $0x1f] sm:$0x1] }
  0x46   :  { %v3062_v0 = vpack.c.bf16 %v761_v60, %v758_v50  ;;  %v3064_v2 = vsub.f32 %v751_v58, %v761_v60  ;;  %v838_v3 = vsub.f32 %v3054_v56, %v837_v62  ;;  %v1339_v37 = vsel %vm117_vm8, %v1338_v20, %v1268_v23  ;;  %v1862_v60 = vld [vmem:[#allocation5 + $0xb] sm:$0x1]  ;;  %v1868_v20 = vld [vmem:[#allocation5 + $0x23] sm:$0x1]  ;;  %v1869_v21 = vld [vmem:[#allocation5 + $0x27] sm:$0x1] }
  0x47   :  { %v3067_v4 = vpack.c.bf16 %v246_v63, %v239_v61  ;;  %v1327_v42 = vsel %vm120_vm9, %v1326_v30, %v1325_v27  ;;  %v1334_v44 = vrot.slane %v1266_v33, 2  ;;  %v1340_v45 = vrot.slane %v1270_v18, 6  ;;  %v1870_v24 = vld [vmem:[#allocation5 + $0x2b] sm:$0x1]  ;;  %v1872_v30 = vld [vmem:[#allocation5 + $0x33] sm:$0x1] }
  0x48   :  { %2747 = vmatpush3.bf16.msra.mxu1 %v3062_v0  ;;  %v844_v5 = vand.u32 4294901760, %v3064_v2  ;;  %v2752_v6 = vpack.c.bf16 %v3064_v2, %v3054_v56  ;;  %v839_v8 = vand.u32 4294901760, %v838_v3  ;;  %v1329_v46 = vsel %vm123_vm10, %v1328_v31, %v1327_v42  ;;  %v1863_v3 = vld [vmem:[#allocation5 + $0xf] sm:$0x1]  ;;  %v1873_v31 = vld [vmem:[#allocation5 + $0x37] sm:$0x1] }
  0x49   :  { %2748 = vmatprep.subr.bf16.mxu1 %v2943_v43  ;;  %v1336_v47 = vrot.slane %v1267_v38, 1  ;;  %v1342_v48 = vrot.slane %v1271_v25, 5  ;;  %v1344_v49 = vrot.slane %v1272_v26, 4  ;;  %v1331_v50 = vsel %vm126_vm11, %v1330_v35, %v1329_v46  ;;  %v1871_v25 = vld [vmem:[#allocation5 + $0x2f] sm:$0x1] }
  0x4a   :  { %v845_v9 = vsub.f32 %v3064_v2, %v844_v5  ;;  %v3079_v13 = vpack.c.bf16 %v844_v5, %v837_v62  ;;  %v1341_v51 = vsel %vm120_vm9, %v1340_v45, %v1339_v37  ;;  %v1346_v52 = vrot.slane %v1273_v29, 3  ;;  %v1864_v5 = vld [vmem:[#allocation5 + $0x13] sm:$0x1] }
  0x4b   :  { %v1348_v53 = vrot.slane %v1274_v34, 2  ;;  %v1333_v57 = vsel %vm129_vm12, %v1332_v36, %v1331_v50  ;;  %v1343_v58 = vsel %vm123_vm10, %v1342_v48, %v1341_v51  ;;  %v1350_v59 = vrot.slane %v1275_v39, 1  ;;  %v1874_v34 = vld [vmem:[#allocation5 + $0x3b] sm:$0x1] }
  0x4c   :  { %v846_v10 = vand.u32 4294901760, %v845_v9  ;;  %v1924_v61 = vrot.slane %v1861_v32, 7  ;;  %v1335_v62 = vsel %vm132_vm13, %v1334_v44, %v1333_v57  ;;  %v1345_v63 = vsel %vm126_vm11, %v1344_v49, %v1343_v58  ;;  %v1875_v44 = vld [vmem:[#allocation5 + $0x3f] sm:$0x1] }
  0x4d   :  { %v1347_v9 = vsel %vm129_vm12, %v1346_v52, %v1345_v63  ;;  %v1926_v22 = vrot.slane %v1862_v60, 6  ;;  %v1928_v26 = vrot.slane %v1863_v3, 5  ;;  %v1930_v27 = vrot.slane %v1864_v5, 4 }
  0x4e   :  { %v3075_v11 = vpack.c.bf16 %v846_v10, %v839_v8  ;;  %v1337_v8 = vsel %vm135_vm14, %v1336_v47, %v1335_v62  ;;  %v1865_v10 = vld [vmem:[#allocation5 + $0x17] sm:$0x1]  ;;  %v1925_v17 = vsel %vm117_vm8, %v1924_v61, %v1860_v55  ;;  %v1349_v18 = vsel %vm132_vm13, %v1348_v53, %v1347_v9 }
  0x4f   :  { %v1358_v19 = vand.u32 4294901760, %v1337_v8  ;;  %v1351_v23 = vsel %vm135_vm14, %v1350_v59, %v1349_v18  ;;  %v1927_v32 = vsel %vm120_vm9, %v1926_v22, %v1925_v17  ;;  %v1932_v33 = vrot.slane %v1865_v10, 3 }
  0x50   :  { %v1361_v28 = vand.u32 4294901760, %v1351_v23  ;;  %v1929_v35 = vsel %vm123_vm10, %v1928_v26, %v1927_v32  ;;  %v1934_v36 = vrot.slane %v1866_v14, 2  ;;  %v1936_v37 = vrot.slane %v1867_v15, 1 }
  0x51   :  { %v3096_v29 = vsub.f32 %v1337_v8, %v1358_v19  ;;  %v1938_v38 = vrot.slane %v1869_v21, 7  ;;  %v1931_v45 = vsel %vm126_vm11, %v1930_v27, %v1929_v35  ;;  %v1940_v46 = vrot.slane %v1870_v24, 6 }
  0x52   :  { %v3100_v39 = vpack.c.bf16 %v1361_v28, %v1358_v19  ;;  %v3102_v42 = vsub.f32 %v1351_v23, %v1361_v28  ;;  %v1933_v47 = vsel %vm129_vm12, %v1932_v33, %v1931_v45  ;;  %v1942_v49 = vrot.slane %v1871_v25, 5 }
  0x53   :  { %v1939_v48 = vsel %vm117_vm8, %v1938_v38, %v1868_v20  ;;  %v1944_v50 = vrot.slane %v1872_v30, 4  ;;  %v1935_v51 = vsel %vm132_vm13, %v1934_v36, %v1933_v47  ;;  %v1946_v53 = vrot.slane %v1873_v31, 3 }
  0x54   :  { %v1941_v52 = vsel %vm120_vm9, %v1940_v46, %v1939_v48  ;;  %v1948_v55 = vrot.slane %v1874_v34, 2  ;;  %v1937_v57 = vsel %vm135_vm14, %v1936_v37, %v1935_v51  ;;  %v1950_v59 = vrot.slane %v1875_v44, 1 }
  0x55   :  { %v1943_v58 = vsel %vm123_vm10, %v1942_v49, %v1941_v52  ;;  %v1437_v60 = vand.u32 4294901760, %v3096_v29  ;;  %v1958_v62 = vand.u32 4294901760, %v1937_v57  ;;  %v1444_v63 = vand.u32 4294901760, %v3102_v42 }
  0x56   :  { %v1945_v61 = vsel %vm126_vm11, %v1944_v50, %v1943_v58  ;;  %v2770_v20 = vpack.c.bf16 %v3102_v42, %v3096_v29  ;;  %vm153_vm0 = vcmask 130048  }
  0x57   :  { %v1947_v3 = vsel %vm129_vm12, %v1946_v53, %v1945_v61  ;;  %v1438_v5 = vsub.f32 %v3096_v29, %v1437_v60  ;;  %v3117_v9 = vsub.f32 %v1937_v57, %v1958_v62  ;;  %v1445_v10 = vsub.f32 %v3102_v42, %v1444_v63 }
  0x58   :  { %v1949_v8 = vsel %vm132_vm13, %v1948_v55, %v1947_v3  ;;  %v3137_v32 = vpack.c.bf16 %v1444_v63, %v1437_v60  ;;  %v2945_v29 = vmov 1966171168  }
  0x59   :  { %v1951_v14 = vsel %vm135_vm14, %v1950_v59, %v1949_v8  ;;  %v1439_v15 = vand.u32 4294901760, %v1438_v5  ;;  %v1446_v18 = vand.u32 4294901760, %v1445_v10  ;;  %v2037_v19 = vand.u32 4294901760, %v3117_v9 }
  0x5a   :  { %v1961_v17 = vand.u32 4294901760, %v1951_v14 }
  0x5b   :  { %v3128_v23 = vpack.c.bf16 %v1446_v18, %v1439_v15  ;;  %v2038_v24 = vsub.f32 %v3117_v9, %v2037_v19 }
  0x5c   :  { %v3124_v21 = vpack.c.bf16 %v1961_v17, %v1958_v62  ;;  %v3126_v22 = vsub.f32 %v1951_v14, %v1961_v17 }
  0x5d   :  { %v2039_v27 = vand.u32 4294901760, %v2038_v24 }
  0x5e   :  { %v2044_v25 = vand.u32 4294901760, %v3126_v22  ;;  %v2788_v26 = vpack.c.bf16 %v3126_v22, %v3117_v9 }
  0x60   :  { %v2045_v28 = vsub.f32 %v3126_v22, %v2044_v25  ;;  %v3139_v33 = vpack.c.bf16 %v2044_v25, %v2037_v19 }
  0x62   :  { %v2046_v30 = vand.u32 4294901760, %v2045_v28 }
  0x64   :  { %v3135_v31 = vpack.c.bf16 %v2046_v30, %v2039_v27 }
  0xae   :  { %v2852_v34 = vpop.trf.xlu0 }
  0xaf   :  { %v2856_v35 = vunpack.i.h.bf16 %v2852_v34  ;;  %v2853_v36 = vunpack.i.l.bf16 %v2852_v34 }
  0xb0   :  { %v2861_v37 = vpop.trf.xlu1 }
  0xb1   :  { %v755_v38 = vsel %vm153_vm0, %v2856_v35, 0  ;;  %v155_v44 = vsel %vm153_vm0, %v2853_v36, 0  ;;  %v2865_v16 = vunpack.i.h.bf16 %v2861_v37  ;;  %v2862_v41 = vunpack.i.l.bf16 %v2861_v37 }
  0xb2   :  { %v824_v45 = vand.u32 4294901760, %v755_v38  ;;  %v224_v46 = vand.u32 4294901760, %v155_v44 }
  0xb3   :  { %v1355_v56 = vsel %vm153_vm0, %v2862_v41, 0 }
  0xb4   :  { %v825_v47 = vsub.f32 %v755_v38, %v824_v45  ;;  %v225_v48 = vsub.f32 %v155_v44, %v224_v46 }
  0xb6   :  { %v226_v49 = vand.u32 4294901760, %v225_v48  ;;  %v826_v50 = vand.u32 4294901760, %v825_v47 }
  0xb8   :  { %v227_v51 = vsub.f32 %v225_v48, %v226_v49  ;;  %v827_v52 = vsub.f32 %v825_v47, %v826_v50 }
  0xba   :  { %v228_v53 = vand.u32 4294901760, %v227_v51  ;;  %v828_v55 = vand.u32 4294901760, %v827_v52 }
  0xbc   :  { %2564 = vmatmul.mubr.f32.vlgmr.msra.gmra.mrb[0].mxu0 %v228_v53  ;;  %2606 = vmatmul.mubr.f32.vlgmr.msra.gmra.mrb[0].mxu1 %v828_v55 }
  0xbd   :  { %2732 = vmatpush3.bf16.msra.mxu0 %v3067_v4  ;;  %2750 = vmatpush3.bf16.msra.mxu1 %v3075_v11  ;;  %v3177_v4 = vand.u32 4294901760, %v1355_v56 }
  0xbe   :  { %2570 = vmatprep.mubr.msk.f32.mxu0 %vm2944_vm15, %v2942_v7  ;;  %2733 = vmatprep.subr.bf16.mxu0 %v2943_v43 }
  0xbf   :  { %2612 = vmatprep.mubr.msk.f32.mxu1 %vm2944_vm15, %v2942_v7  ;;  %2751 = vmatprep.subr.bf16.mxu1 %v2943_v43  ;;  %v1425_v11 = vsub.f32 %v1355_v56, %v3177_v4 }
  0xc4   :  { %2571 = vmatmul.mubr.f32.vlgmr.msra.gmra.mrb[0].mxu0 %v224_v46  ;;  %2613 = vmatmul.mubr.f32.vlgmr.msra.gmra.mrb[0].mxu1 %v824_v45 }
  0xc5   :  { %2735 = vmatpush3.bf16.msra.mxu0 %v2734_v54  ;;  %2753 = vmatpush3.bf16.msra.mxu1 %v2752_v6  ;;  %v1955_v54 = vsel %vm153_vm0, %v2865_v16, 0 }
  0xc6   :  { %2577 = vmatprep.mubr.msk.f32.mxu0 %vm2944_vm15, %v2942_v7  ;;  %2736 = vmatprep.subr.bf16.mxu0 %v2943_v43  ;;  %v3175_v2 = vand.u32 4294901760, %v1955_v54 }
  0xc7   :  { %2619 = vmatprep.mubr.msk.f32.mxu1 %vm2944_vm15, %v2942_v7  ;;  %2754 = vmatprep.subr.bf16.mxu1 %v2943_v43 }
  0xc8   :  { %v2025_v6 = vsub.f32 %v1955_v54, %v3175_v2 }
  0xcc   :  { %2578 = vmatmul.mubr.f32.vlgmr.msra.gmra.mrb[0].mxu0 %v225_v48  ;;  %2620 = vmatmul.mubr.f32.vlgmr.msra.gmra.mrb[0].mxu1 %v825_v47 }
  0xcd   :  { %2738 = vmatpush3.bf16.msra.mxu0 %v3035_v40  ;;  %2756 = vmatpush3.bf16.msra.mxu1 %v3062_v0 }
  0xce   :  { %2584 = vmatprep.mubr.msk.f32.mxu0 %vm2944_vm15, %v2942_v7  ;;  %2739 = vmatprep.subr.bf16.mxu0 %v2943_v43 }
  0xcf   :  { %2626 = vmatprep.mubr.msk.f32.mxu1 %vm2944_vm15, %v2942_v7  ;;  %2757 = vmatprep.subr.bf16.mxu1 %v2943_v43 }
  0xd4   :  { %2585 = vmatmul.mubr.f32.vlgmr.msra.gmra.mrb[0].mxu0 %v226_v49  ;;  %2627 = vmatmul.mubr.f32.vlgmr.msra.gmra.mrb[0].mxu1 %v826_v50 }
  0xd5   :  { %2741 = vmatpush3.bf16.msra.mxu0 %v3077_v12  ;;  %2759 = vmatpush3.bf16.msra.mxu1 %v3079_v13  ;;  %v1426_v12 = vand.u32 4294901760, %v1425_v11  ;;  %v2026_v13 = vand.u32 4294901760, %v2025_v6 }
  0xd6   :  { %2591 = vmatprep.mubr.msk.f32.mxu0 %vm2944_vm15, %v2942_v7  ;;  %2742 = vmatprep.subr.bf16.mxu0 %v2943_v43 }
  0xd7   :  { %2633 = vmatprep.mubr.msk.f32.mxu1 %vm2944_vm15, %v2942_v7  ;;  %2760 = vmatprep.subr.bf16.mxu1 %v2943_v43  ;;  %v1427_v57 = vsub.f32 %v1425_v11, %v1426_v12  ;;  %v2027_v58 = vsub.f32 %v2025_v6, %v2026_v13 }
  0xdc   :  { %2592 = vmatmul.mubr.f32.vlgmr.msra.gmra.mrb[0].mxu0 %v224_v46  ;;  %2634 = vmatmul.mubr.f32.vlgmr.msra.gmra.mrb[0].mxu1 %v824_v45 }
  0xdd   :  { %2744 = vmatpush3.bf16.msra.mxu0 %v3035_v40  ;;  %2762 = vmatpush3.bf16.msra.mxu1 %v3062_v0  ;;  %v1428_v40 = vand.u32 4294901760, %v1427_v57  ;;  %v2028_v0 = vand.u32 4294901760, %v2027_v58 }
  0xde   :  { %2598 = vmatprep.mubr.msk.f32.mxu0 %vm2944_vm15, %v2942_v7  ;;  %2640 = vmatprep.mubr.msk.f32.mxu1 %vm2944_vm15, %v2942_v7 }
  0xdf   :  { %2763 = vmatprep.subr.bf16.mxu0 %v2943_v43  ;;  %2781 = vmatprep.subr.bf16.mxu1 %v2943_v43 }
  0xe4   :  { %2599 = vmatmul.mubr.f32.vlgmr.msra.gmra.mrb[0].mxu0 %v224_v46  ;;  %2641 = vmatmul.mubr.f32.vlgmr.msra.gmra.mrb[0].mxu1 %v824_v45 }
  0xe5   :  { %2765 = vmatpush3.bf16.msra.mxu0 %v3100_v39  ;;  %2783 = vmatpush3.bf16.msra.mxu1 %v3124_v21 }
  0xe6   :  { %2647 = vmatprep.mubr.msk.f32.mxu0 %vm2944_vm15, %v2942_v7  ;;  %2766 = vmatprep.subr.bf16.mxu0 %v2943_v43 }
  0xe7   :  { %2689 = vmatprep.mubr.msk.f32.mxu1 %vm2944_vm15, %v2942_v7  ;;  %2784 = vmatprep.subr.bf16.mxu1 %v2943_v43 }
  0xe8   :  { %2648 = vmatmul.mubr.f32.vlgmr.msra.gmra.mrb[2].mxu0 %v1428_v40  ;;  %2690 = vmatmul.mubr.f32.vlgmr.msra.gmra.mrb[2].mxu1 %v2028_v0 }
  0xe9   :  { %2768 = vmatpush3.bf16.msra.mxu0 %v3128_v23  ;;  %2786 = vmatpush3.bf16.msra.mxu1 %v3135_v31 }
  0xea   :  { %2654 = vmatprep.mubr.msk.f32.mxu0 %vm2944_vm15, %v2942_v7  ;;  %2769 = vmatprep.subr.bf16.mxu0 %v2943_v43 }
  0xeb   :  { %2696 = vmatprep.mubr.msk.f32.mxu1 %vm2944_vm15, %v2942_v7  ;;  %2787 = vmatprep.subr.bf16.mxu1 %v2943_v43 }
  0xf0   :  { %2655 = vmatmul.mubr.f32.vlgmr.msra.gmra.mrb[2].mxu0 %v3177_v4  ;;  %2697 = vmatmul.mubr.f32.vlgmr.msra.gmra.mrb[2].mxu1 %v3175_v2 }
  0xf1   :  { %2771 = vmatpush3.bf16.msra.mxu0 %v2770_v20  ;;  %2789 = vmatpush3.bf16.msra.mxu1 %v2788_v26 }
  0xf2   :  { %2661 = vmatprep.mubr.msk.f32.mxu0 %vm2944_vm15, %v2942_v7  ;;  %2772 = vmatprep.subr.bf16.mxu0 %v2943_v43 }
  0xf3   :  { %2703 = vmatprep.mubr.msk.f32.mxu1 %vm2944_vm15, %v2942_v7  ;;  %2790 = vmatprep.subr.bf16.mxu1 %v2943_v43 }
  0xf8   :  { %2662 = vmatmul.mubr.f32.vlgmr.msra.gmra.mrb[2].mxu0 %v1425_v11  ;;  %2704 = vmatmul.mubr.f32.vlgmr.msra.gmra.mrb[2].mxu1 %v2025_v6 }
  0xf9   :  { %2774 = vmatpush3.bf16.msra.mxu0 %v3100_v39  ;;  %2792 = vmatpush3.bf16.msra.mxu1 %v3124_v21 }
  0xfa   :  { %2668 = vmatprep.mubr.msk.f32.mxu0 %vm2944_vm15, %v2942_v7  ;;  %2775 = vmatprep.subr.bf16.mxu0 %v2943_v43 }
  0xfb   :  { %2710 = vmatprep.mubr.msk.f32.mxu1 %vm2944_vm15, %v2942_v7  ;;  %2793 = vmatprep.subr.bf16.mxu1 %v2943_v43 }
 0x100   :  { %2669 = vmatmul.mubr.f32.vlgmr.msra.gmra.mrb[2].mxu0 %v1426_v12  ;;  %2711 = vmatmul.mubr.f32.vlgmr.msra.gmra.mrb[2].mxu1 %v2026_v13 }
 0x101   :  { %2777 = vmatpush3.bf16.msra.mxu0 %v3137_v32  ;;  %2795 = vmatpush3.bf16.msra.mxu1 %v3139_v33 }
 0x102   :  { %2675 = vmatprep.mubr.msk.f32.mxu0 %vm2944_vm15, %v2942_v7  ;;  %2778 = vmatprep.subr.bf16.mxu0 %v2943_v43 }
 0x103   :  { %2717 = vmatprep.mubr.msk.f32.mxu1 %vm2944_vm15, %v2942_v7  ;;  %2796 = vmatprep.subr.bf16.mxu1 %v2943_v43  ;;  %v618_v43 = vunpack.c.l.s4 %v2945_v29 }
 0x105   :  { %v619_v42 = vunpack.c.0.s8 %v618_v43 }
 0x107   :  { %v622_v59 = vsub.s32 %v619_v42, %v2996_v1 }
 0x108   :  { %2676 = vmatmul.mubr.f32.vlgmr.msra.gmra.mrb[2].mxu0 %v3177_v4  ;;  %2718 = vmatmul.mubr.f32.vlgmr.msra.gmra.mrb[2].mxu1 %v3175_v2 }
 0x109   :  { %2780 = vmatpush3.bf16.msra.mxu0 %v3100_v39  ;;  %2798 = vmatpush3.bf16.msra.mxu1 %v3124_v21 }
 0x10a   :  { %2682 = vmatprep.mubr.msk.f32.mxu0 %vm2944_vm15, %v2942_v7  ;;  %2724 = vmatprep.mubr.msk.f32.mxu1 %vm2944_vm15, %v2942_v7 }
 0x110   :  { %2683 = vmatmul.mubr.f32.vlgmr.msra.gmra.mrb[2].mxu0 %v3177_v4  ;;  %2725 = vmatmul.mubr.f32.vlgmr.msra.gmra.mrb[2].mxu1 %v3175_v2 }
 0x1b7   :  { %v612_v60 = vpop.f32.mrb[0].mxu0  ;;  %v1212_v61 = vpop.f32.mrb[0].mxu1 }
 0x1b8   :  { %v623_v39 = vrot.slane %v612_v60, %v622_v59  ;;  %v1223_v62 = vrot.slane %v1212_v61, %v622_v59  ;;  %v2600_v63 = vpop.f32.mrb[1].mxu0  ;;  %v2642_v3 = vpop.f32.mrb[1].mxu1 }
 0x1ba   :  { %v624_v5 = vcombine.high %v623_v39, %v623_v39  ;;  %v631_v8 = vrot.slane %v623_v39, %v622_v59  ;;  %2470 = vst.sshfl [vmem:[#allocation7] sm:$0x1 pattern:$0x73625140] %v623_v39  ;;  %v1224_v9 = vcombine.high %v1223_v62, %v1223_v62  ;;  %v1231_v7 = vrot.slane %v1223_v62, %v622_v59 }
 0x1bb   :  { %2475 = vst.sshfl [vmem:[#allocation7 + $0x1] sm:$0x1 pattern:$0x73625140] %v1223_v62 }
 0x1bc   :  { %v638_v10 = vrot.slane %v624_v5, %v622_v59  ;;  %v639_v14 = vcombine.high %v631_v8, %v631_v8  ;;  %2471 = vst.sshfl [vmem:[#allocation7 + $0x4] sm:$0x1 pattern:$0x73625140] %v624_v5  ;;  %v1238_v15 = vrot.slane %v1224_v9, %v622_v59  ;;  %v1239_v17 = vcombine.high %v1231_v7, %v1231_v7 }
 0x1bd   :  { %2476 = vst.sshfl [vmem:[#allocation7 + $0x5] sm:$0x1 pattern:$0x73625140] %v1224_v9 }
 0x1be   :  { %v640_v18 = vcombine.high %v638_v10, %v638_v10  ;;  %647 = vst [vmem:[#allocation7 + $0x8] sm:$0x1] %v639_v14  ;;  %v1240_v1 = vcombine.high %v1238_v15, %v1238_v15  ;;  %1247 = vst [vmem:[#allocation7 + $0x9] sm:$0x1] %v1239_v17 }
 0x1c0   :  { %648 = vst [vmem:[#allocation7 + $0xc] sm:$0x1] %v640_v18  ;;  %1248 = vst [vmem:[#allocation7 + $0xd] sm:$0x1] %v1240_v1 }
 0x1e3   :  { %v1812_v19 = vpop.f32.mrb[2].mxu0  ;;  %v2412_v20 = vpop.f32.mrb[2].mxu1 }
 0x1e4   :  { %v1823_v21 = vrot.slane %v1812_v19, %v622_v59  ;;  %v2423_v22 = vrot.slane %v2412_v20, %v622_v59  ;;  %v2684_v23 = vpop.f32.mrb[3].mxu0  ;;  %v2726_v24 = vpop.f32.mrb[3].mxu1 }
 0x1e6   :  { %v1824_v25 = vcombine.high %v1823_v21, %v1823_v21  ;;  %v1831_v26 = vrot.slane %v1823_v21, %v622_v59  ;;  %2480 = vst.sshfl [vmem:[#allocation7 + $0x2] sm:$0x1 pattern:$0x73625140] %v1823_v21  ;;  %v2424_v27 = vcombine.high %v2423_v22, %v2423_v22  ;;  %v2431_v28 = vrot.slane %v2423_v22, %v622_v59 }
 0x1e7   :  { %2485 = vst.sshfl [vmem:[#allocation7 + $0x3] sm:$0x1 pattern:$0x73625140] %v2423_v22 }
 0x1e8   :  { %v1838_v30 = vrot.slane %v1824_v25, %v622_v59  ;;  %v1839_v31 = vcombine.high %v1831_v26, %v1831_v26  ;;  %2481 = vst.sshfl [vmem:[#allocation7 + $0x6] sm:$0x1 pattern:$0x73625140] %v1824_v25  ;;  %v2438_v32 = vrot.slane %v2424_v27, %v622_v59  ;;  %v2439_v33 = vcombine.high %v2431_v28, %v2431_v28 }
 0x1e9   :  { %2486 = vst.sshfl [vmem:[#allocation7 + $0x7] sm:$0x1 pattern:$0x73625140] %v2424_v27 }
 0x1ea   :  { %v1840_v34 = vcombine.high %v1838_v30, %v1838_v30  ;;  %1847 = vst [vmem:[#allocation7 + $0xa] sm:$0x1] %v1839_v31  ;;  %v2440_v35 = vcombine.high %v2438_v32, %v2438_v32  ;;  %2447 = vst [vmem:[#allocation7 + $0xb] sm:$0x1] %v2439_v33 }
 0x1ec   :  { %1848 = vst [vmem:[#allocation7 + $0xe] sm:$0x1] %v1840_v34  ;;  %2448 = vst [vmem:[#allocation7 + $0xf] sm:$0x1] %v2440_v35 }
 0x1ed   :  { %2921 = shalt.err (!%p2918_p6)
}
 0x1ee   :  { %s2922_s10 = scalar_lea.hbm %s3269_s2, 256 }
 0x1ef   :  { %p2923_p7 = scmp.ne.s32.totalorder %s3269_s2, %s2922_s10  ;;  %p2926_p8 = scmp.lt.u32.totalorder %s2922_s10, %s3269_s2 }
 0x1f1   :  { %p2928_p9 = pnand %p2926_p8, %p2923_p7 }
 0x1f3   :  { %2931 = shalt.err (!%p2928_p9)
}
 0x1f4   :  { %2460 = dma.vmem_to_hbm [thread:$0]  %s2455_s6, 256, %s3269_s2, [#allocation4], %s2940_s0, %s2940_s0, %s2941_s3  }
 0x1f5   :  { %2936 = dma.done.wait [#allocation4], 256  }
 0x1f6   :  { %2937 = vsyncadd [#allocation4], 4294967040 }
 0x1f7   :  { %2464 = vsyncpa [#allocation3], 1 }
 0x1f8   :  { %2465 = vsyncpa [#allocation6], 1 }
 0x1f9   :  { %2466 = vsyncpa [#allocation4], 1 }

</bundles_post_ra>
